<compile_context>
chip_gen: v7x
topology: tpu7x:2x2x1
jax: 0.10.0
libtpu: 0.0.40
codegen_flags: <defaults>
</compile_context>

<pallas_src>
import math
import functools

import jax
import jax.numpy as jnp
from jax import lax
from jax.experimental import pallas as pl
from jax.experimental.pallas import tpu as pltpu


def _round_up(n, m):
    return ((n + m - 1) // m) * m


def _cdiv(a, b):
    return -(-a // b)


def _default_block_m(B, sublane):
    """Batch tile: >=2 grid steps when B is large enough (v7x dual-TC sharding),
    MXU-friendly multiples of `sublane`, capped at 256, minimal pad waste."""
    if B <= sublane:
        return sublane
    steps = max(2, _cdiv(B, 256))
    return min(_round_up(_cdiv(B, steps), sublane), 256)


def _vmem_limit_bytes(block_m, D, CH, O_pad, in_itemsize):
    weights = (D * CH + CH * O_pad) * in_itemsize + (CH + O_pad) * 4  # biases f32
    tiles = block_m * D * in_itemsize + block_m * O_pad * 4           # out f32
    # pipeliner double-buffers inputs/outputs by default; + compiler margin
    need = 2 * (weights + tiles) + (2 << 20)
    return max(8 << 20, min(_round_up(need, 1 << 20), 32 << 20))


def _pose_regressor_kernel(x_ref, w1_ref, b1_ref, w2_ref, b2_ref, o_ref,
                           *, approximate_gelu):
    # x_ref : (BM, D)     w1_ref: (D, CH)    b1_ref: (1, CH)   [f32]
    # w2_ref: (CH, Op)    b2_ref: (1, Op)    o_ref : (BM, Op)  [f32]
    # fc_h / fc_h_prior: native-dtype MXU matmul (bf16 fast path when the
    # prepared weights are bf16), f32 accumulation, f32 bias add.
    h = jnp.dot(x_ref[...], w1_ref[...],
                preferred_element_type=jnp.float32) + b1_ref[...]

    if approximate_gelu:
        # tanh GELU -> EUP slot (overlaps MXU); small deviation from torch default
        c = math.sqrt(2.0 / math.pi)
        h = 0.5 * h * (1.0 + jnp.tanh(c * (h + 0.044715 * (h * h * h))))
    else:
        # exact erf GELU (matches torch.nn.functional.gelu default)
        h = 0.5 * h * (1.0 + lax.erf(h * (1.0 / math.sqrt(2.0))))

    # fc_o: cast activation to the weight dtype (keeps bf16 MXU path; no-op
    # for f32 weights), accumulate in f32, add f32 bias.
    y = jnp.dot(h.astype(w2_ref.dtype), w2_ref[...],
                preferred_element_type=jnp.float32) + b2_ref[...]

    o_ref[...] = y.astype(o_ref.dtype)


def prepare_pose_regressor_params(w1, b1, w2, b2, *, compute_dtype=jnp.bfloat16):
    """One-time (amortized) param prep: lane-align the output dim to 128,
    reshape biases to (1, N), cast matmul weights to the MXU compute dtype.
    Biases stay f32 (they are added on the f32 accumulator inside the kernel).

    w1: (Din, CH), b1: (CH,), w2: (CH, O), b2: (O,)  [(fan_in, fan_out) layout]
    """
    Din, CH = w1.shape
    O = w2.shape[1]
    O_pad = _round_up(max(O, 128), 128)
    w1_p = w1.astype(compute_dtype)
    b1_p = b1.reshape(1, CH).astype(jnp.float32)
    w2_p = jnp.pad(w2, ((0, 0), (0, O_pad - O))).astype(compute_dtype)
    b2_p = jnp.pad(b2, (0, O_pad - O)).reshape(1, O_pad).astype(jnp.float32)
    return w1_p, b1_p, w2_p, b2_p


@functools.partial(jax.jit,
                   static_argnames=("output_dim", "block_m", "approximate_gelu"))
def pose_regressor_forward(x, w1, b1, w2, b2, *, output_dim,
                           block_m=None, approximate_gelu=False):
    """x: (B, Din); w1/b1/w2/b2 are the *prepared* params from
    prepare_pose_regressor_params(). Returns (B, output_dim) float32."""
    B, D = x.shape
    Dw, CH = w1.shape
    assert D == Dw, "x feature dim must match fc_h fan_in"
    O_pad = w2.shape[1]
    assert O_pad % 128 == 0, "params must come from prepare_pose_regressor_params"

    compute_dtype = w1.dtype
    x = x.astype(compute_dtype)   # hot path only touches x (weights pre-padded)

    sublane = 16 if compute_dtype == jnp.bfloat16 else 8
    if block_m is None:
        block_m = _default_block_m(B, sublane)
    B_pad = _round_up(B, block_m)
    if B_pad != B:
        x = jnp.pad(x, ((0, B_pad - B), (0, 0)))

    grid = (B_pad // block_m,)
    kernel = functools.partial(_pose_regressor_kernel,
                               approximate_gelu=approximate_gelu)

    out = pl.pallas_call(
        kernel,
        out_shape=jax.ShapeDtypeStruct((B_pad, O_pad), jnp.float32),
        grid_spec=pl.GridSpec(
            grid=grid,
            in_specs=[
                pl.BlockSpec((block_m, D), lambda i: (i, 0)),   # x tile
                pl.BlockSpec((D, CH), lambda i: (0, 0)),        # W1 (resident)
                pl.BlockSpec((1, CH), lambda i: (0, 0)),        # b1 (resident)
                pl.BlockSpec((CH, O_pad), lambda i: (0, 0)),    # W2 (resident)
                pl.BlockSpec((1, O_pad), lambda i: (0, 0)),     # b2 (resident)
            ],
            out_specs=pl.BlockSpec((block_m, O_pad), lambda i: (i, 0)),
        ),
        compiler_params=pltpu.CompilerParams(
            dimension_semantics=("parallel",),   # batch axis -> both TCs on v7x
            vmem_limit_bytes=_vmem_limit_bytes(
                block_m, D, CH, O_pad, jnp.dtype(compute_dtype).itemsize),
        ),
    )(x, w1, b1, w2, b2)

    return out[:B, :output_dim]


def init_pose_regressor_params(key, decoder_dim, output_dim, use_prior=False):
    """Synthetic init mirroring the torch module's shapes.
    Weights: xavier_uniform (as in _reset_parameters); biases: small uniform.
    If use_prior, the first layer takes decoder_dim*2 inputs (fc_h_prior)."""
    ch = 1024
    in_dim = decoder_dim * 2 if use_prior else decoder_dim
    k1, k2, k3, k4 = jax.random.split(key, 4)

    def xavier(k, fan_in, fan_out):
        bound = math.sqrt(6.0 / (fan_in + fan_out))
        # stored as (fan_in, fan_out) so the kernel does x @ W directly
        return jax.random.uniform(k, (fan_in, fan_out), jnp.float32, -bound, bound)

    w1 = xavier(k1, in_dim, ch)
    b1 = jax.random.uniform(k2, (ch,), jnp.float32,
                            -1.0 / math.sqrt(in_dim), 1.0 / math.sqrt(in_dim))
    w2 = xavier(k3, ch, output_dim)
    b2 = jax.random.uniform(k4, (output_dim,), jnp.float32,
                            -1.0 / math.sqrt(ch), 1.0 / math.sqrt(ch))
    return w1, b1, w2, b2


def pose_regressor_reference(x, w1, b1, w2, b2):
    h = jax.nn.gelu(x @ w1 + b1, approximate=False)
    return h @ w2 + b2


if __name__ == "__main__":
    key = jax.random.PRNGKey(0)
    kx, kp, kx2, kp2 = jax.random.split(key, 4)

    decoder_dim = 32    # small hidden size for the demo
    output_dim = 7      # pose output (3 translation + 4 quaternion)

    # --- use_prior = False, f32 compute path (bit-close to torch, tight tol) ---
    batch = 24          # > sublane -> 2 grid steps (exercises batch tiling)
    x = jax.random.normal(kx, (batch, decoder_dim), jnp.float32)
    w1, b1, w2, b2 = init_pose_regressor_params(kp, decoder_dim, output_dim,
                                                use_prior=False)
    params_f32 = prepare_pose_regressor_params(w1, b1, w2, b2,
                                               compute_dtype=jnp.float32)
    out = jax.block_until_ready(
        pose_regressor_forward(x, *params_f32, output_dim=output_dim))
    ref = pose_regressor_reference(x, w1, b1, w2, b2)
    assert out.shape == (batch, output_dim)
    assert jnp.allclose(out, ref, atol=1e-4, rtol=1e-4), "mismatch (f32, no prior)"

    # --- use_prior = True, bf16 MXU fast path (f32 accumulation, relaxed tol) ---
    batch2 = 8
    x2 = jax.random.normal(kx2, (batch2, decoder_dim * 2), jnp.float32)
    w1p, b1p, w2p, b2p = init_pose_regressor_params(kp2, decoder_dim, output_dim,
                                                    use_prior=True)
    params_bf16 = prepare_pose_regressor_params(w1p, b1p, w2p, b2p,
                                                compute_dtype=jnp.bfloat16)
    out2 = jax.block_until_ready(
        pose_regressor_forward(x2, *params_bf16, output_dim=output_dim))
    ref2 = pose_regressor_reference(x2, w1p, b1p, w2p, b2p)
    assert out2.shape == (batch2, output_dim)
    assert jnp.allclose(out2, ref2, atol=3e-2, rtol=3e-2), "mismatch (bf16, prior)"

    print("KERNEL_OK")
</pallas_src>

<mosaic_0001>
module attributes {stable_mosaic.version = 11 : i64} {
  func.func @_pose_regressor_kernel(%arg0: i32, %arg1: memref<16x32xf32, #tpu.memory_space<vmem>>, %arg2: memref<32x1024xf32, #tpu.memory_space<vmem>>, %arg3: memref<1x1024xf32, #tpu.memory_space<vmem>>, %arg4: memref<1024x128xf32, #tpu.memory_space<vmem>>, %arg5: memref<1x128xf32, #tpu.memory_space<vmem>>, %arg6: memref<16x128xf32, #tpu.memory_space<vmem>>) attributes {dimension_semantics = [#tpu.dimension_semantics<parallel>], iteration_bounds = array<i64: 2>, scalar_prefetch = 0 : i64, scratch_operands = 0 : i64, tpu.core_type = #tpu.core_type<tc>, window_params = [{transform_indices = @transform_0, window_bounds = array<i64: 16, 32>}, {pipeline_mode = #tpu.pipeline_mode<synchronous>, transform_indices = @transform_1, window_bounds = array<i64: 32, 1024>}, {pipeline_mode = #tpu.pipeline_mode<synchronous>, transform_indices = @transform_2, window_bounds = array<i64: 1, 1024>}, {pipeline_mode = #tpu.pipeline_mode<synchronous>, transform_indices = @transform_3, window_bounds = array<i64: 1024, 128>}, {pipeline_mode = #tpu.pipeline_mode<synchronous>, transform_indices = @transform_4, window_bounds = array<i64: 1, 128>}, {transform_indices = @transform_5, window_bounds = array<i64: 16, 128>}]} {
    %c0 = arith.constant 0 : index
    %c0_0 = arith.constant 0 : index
    %0 = vector.load %arg1[%c0, %c0_0] : memref<16x32xf32, #tpu.memory_space<vmem>>, vector<16x32xf32>
    %c0_1 = arith.constant 0 : index
    %c0_2 = arith.constant 0 : index
    %1 = vector.load %arg2[%c0_1, %c0_2] : memref<32x1024xf32, #tpu.memory_space<vmem>>, vector<32x1024xf32>
    %cst = arith.constant dense<0.000000e+00> : vector<16x1024xf32>
    %2 = tpu.matmul %0, %1, %cst {dimension_numbers = #tpu.dot_dimension_numbers<[1], [0], [0], [1], [0, 0, 1, 1], [], []>} : vector<16x32xf32>, vector<32x1024xf32>, vector<16x1024xf32> -> vector<16x1024xf32>
    %c0_3 = arith.constant 0 : index
    %c0_4 = arith.constant 0 : index
    %3 = vector.load %arg3[%c0_3, %c0_4] : memref<1x1024xf32, #tpu.memory_space<vmem>>, vector<1x1024xf32>
    %4 = vector.broadcast %3 : vector<1x1024xf32> to vector<16x1024xf32>
    %5 = arith.addf %2, %4 : vector<16x1024xf32>
    %cst_5 = arith.constant 5.000000e-01 : f32
    %6 = vector.broadcast %cst_5 : f32 to vector<16x1024xf32>
    %7 = arith.mulf %6, %5 : vector<16x1024xf32>
    %cst_6 = arith.constant 0.707106769 : f32
    %8 = vector.broadcast %cst_6 : f32 to vector<16x1024xf32>
    %9 = arith.mulf %5, %8 : vector<16x1024xf32>
    %10 = math.erf %9 : vector<16x1024xf32>
    %cst_7 = arith.constant 1.000000e+00 : f32
    %11 = vector.broadcast %cst_7 : f32 to vector<16x1024xf32>
    %12 = arith.addf %11, %10 : vector<16x1024xf32>
    %13 = arith.mulf %7, %12 : vector<16x1024xf32>
    %c0_8 = arith.constant 0 : index
    %c0_9 = arith.constant 0 : index
    %14 = vector.load %arg4[%c0_8, %c0_9] : memref<1024x128xf32, #tpu.memory_space<vmem>>, vector<1024x128xf32>
    %cst_10 = arith.constant dense<0.000000e+00> : vector<16x128xf32>
    %15 = tpu.matmul %13, %14, %cst_10 {dimension_numbers = #tpu.dot_dimension_numbers<[1], [0], [0], [1], [0, 0, 1, 1], [], []>} : vector<16x1024xf32>, vector<1024x128xf32>, vector<16x128xf32> -> vector<16x128xf32>
    %c0_11 = arith.constant 0 : index
    %c0_12 = arith.constant 0 : index
    %16 = vector.load %arg5[%c0_11, %c0_12] : memref<1x128xf32, #tpu.memory_space<vmem>>, vector<1x128xf32>
    %17 = vector.broadcast %16 : vector<1x128xf32> to vector<16x128xf32>
    %18 = arith.addf %15, %17 : vector<16x128xf32>
    %c0_13 = arith.constant 0 : index
    %c0_14 = arith.constant 0 : index
    %19 = vector.load %arg6[%c0_13, %c0_14] : memref<16x128xf32, #tpu.memory_space<vmem>>, vector<16x128xf32>
    tpu.vector_store %arg6[%c0_13, %c0_14], %18 {strides = array<i32>} : memref<16x128xf32, #tpu.memory_space<vmem>>, vector<16x128xf32>,
    return
  }
  func.func @transform_0(%arg0: i32) -> (i32, i32) {
    %c0_i32 = arith.constant 0 : i32
    %c0_i32_0 = arith.constant 0 : i32
    return %arg0, %c0_i32 : i32, i32
  }
  func.func @transform_1(%arg0: i32) -> (i32, i32) {
    %c0_i32 = arith.constant 0 : i32
    %c0_i32_0 = arith.constant 0 : i32
    %c0_i32_1 = arith.constant 0 : i32
    return %c0_i32, %c0_i32_0 : i32, i32
  }
  func.func @transform_2(%arg0: i32) -> (i32, i32) {
    %c0_i32 = arith.constant 0 : i32
    %c0_i32_0 = arith.constant 0 : i32
    %c0_i32_1 = arith.constant 0 : i32
    return %c0_i32, %c0_i32_0 : i32, i32
  }
  func.func @transform_3(%arg0: i32) -> (i32, i32) {
    %c0_i32 = arith.constant 0 : i32
    %c0_i32_0 = arith.constant 0 : i32
    %c0_i32_1 = arith.constant 0 : i32
    return %c0_i32, %c0_i32_0 : i32, i32
  }
  func.func @transform_4(%arg0: i32) -> (i32, i32) {
    %c0_i32 = arith.constant 0 : i32
    %c0_i32_0 = arith.constant 0 : i32
    %c0_i32_1 = arith.constant 0 : i32
    return %c0_i32, %c0_i32_0 : i32, i32
  }
  func.func @transform_5(%arg0: i32) -> (i32, i32) {
    %c0_i32 = arith.constant 0 : i32
    %c0_i32_0 = arith.constant 0 : i32
    return %arg0, %c0_i32 : i32, i32
  }
}

</mosaic_0001>

<bundles_post_ra>
// kernel: pose_regressor_forward.1
= control target key start
LH: loop header
LB: loop body
LE: loop exit
PB: predicated region body
PF: predicated region fallthrough
CT: control target
= control target key end

     0   :  { %10 = vsyncpa [#allocation3], 0  ;;  %s1997_s0 = inlined_call_operand.vmem [shape: f32[32,32], index: 0, kind: input, shape index: {}]   ;;  %s1998_s1 = inlined_call_operand.hbm [shape: f32[32,1024], index: 1, kind: input, shape index: {}]   ;;  %s1999_s2 = inlined_call_operand.vmem [shape: f32[1,1024], index: 2, kind: input, shape index: {}]   ;;  %s2000_s3 = inlined_call_operand.hbm [shape: f32[1024,128], index: 3, kind: input, shape index: {}]   ;;  %s2001_s4 = inlined_call_operand.vmem [shape: f32[1,128], index: 4, kind: input, shape index: {}]   ;;  %s2002_s5 = inlined_call_operand.vmem [shape: f32[32,128], index: 5, kind: output, shape index: {}]  }
   0x1   :  { %11 = vsyncpa [#allocation5], 0  ;;  %s1755_s18 = smov 0  }
   0x2 LB: > { %s1718_s19 = smov [#allocation2]   ;;  %s1244_s21 = sadd.s32 4294967295, %s1716_s18   ;;  %s1716_s18 = sphi %s1755_s18, %s17_s18  }
   0x3   : > { %s170_s20 = sshll.u32 %s1718_s19, 4  ;;  %p1246_p0 = scmp.ge.s32.totalorder %s1716_s18, 1  ;;  %s171_s20 = int_to_ptr.vmem [resolvable:$true] %s170_s20 }
   0x4   : > { %p158_p1 = scmp.lt.s32.totalorder %s1716_s18, 3  ;;  %p1769_p3 = scmp.eq.s32.totalorder %s1244_s21, 0 }
   0x5   : > { %s1719_s24 = smov [#allocation4]   ;;  %s1646_s29 = scalar_lea.hbm %s1998_s1, 4096 }
   0x6   : > { %p1763_p2 = pnand %p1246_p0, %p158_p1  ;;  %s186_s25 = sshll.u32 %s1719_s24, 4  ;;  %s1781_s25 = int_to_ptr.vmem [resolvable:$true] %s186_s25 }
   0x7   : > { %s2007_s23 = scalar_select %p1769_p3, 1, 0 }
   0x8   : > { %s2006_s22 = scalar_select %p1763_p2, 1, 0 }
   0x9   : > { %p1588_p4 = pneg %p1763_p2  ;;  %p1647_p6 = scmp.ne.s32.totalorder %s1998_s1, %s1646_s29 }
   0xa   : > { %p1653_p10 = scmp.lt.u32.totalorder %s1646_s29, %s1998_s1 }
   0xb   : > { %p1777_p5 = pnand %p1769_p3, %p1588_p4 }
   0xd   : > { %p1648_p7 = pneg %p1777_p5 }
   0xf   : > { %p1649_p8 = pnand %p1648_p7, %p1647_p6 }
  0x11   : > { %p1650_p9 = pneg %p1649_p8 }
  0x13   : > { %p1655_p11 = pnand %p1653_p10, %p1650_p9 }
  0x15   : > { %1658 = shalt.err (!%p1655_p11)
}
  0x16   : > { %s1659_s9 = scalar_lea.vmem %s171_s20, 4096  ;;  %p1667_p1 = scmp.lt.s32.totalorder %s171_s20, %s171_s20 }
  0x17   : > { %p1660_p12 = scmp.ne.s32.totalorder %s171_s20, %s1659_s9  ;;  %p1668_p4 = scmp.lt.s32.totalorder %s1659_s9, %s1659_s9 }
  0x19   : > { %p1662_p13 = pnand %p1660_p12, %p1648_p7  ;;  %p1669_p3 = por %p1668_p4, %p1667_p1 }
  0x1b   : > { %p1663_p0 = pneg %p1662_p13 }
  0x1d   : > { %p1670_p2 = pnand %p1669_p3, %p1663_p0 }
  0x1f   : > { %1673 = shalt.err (!%p1670_p2)
}
  0x20   : > { %s1720_s10 = smov 1024   ;;  %s1721_s11 = smov 64  }
  0x21   : > { %1591 = dma.hbm_to_vmem [thread:$0]  (!%p1777_p5), %s1998_s1, 4096, %s171_s20, [#allocation3], %s1720_s10, %s1720_s10, %s1721_s11  }
  0x22   : > { %s1674_s16 = scalar_lea.hbm %s2000_s3, 16384 }
  0x23   : > { %p1675_p6 = scmp.ne.s32.totalorder %s2000_s3, %s1674_s16  ;;  %p1681_p8 = scmp.lt.u32.totalorder %s1674_s16, %s2000_s3 }
  0x25   : > { %p1677_p2 = pnand %p1675_p6, %p1648_p7 }
  0x27   : > { %p1678_p3 = pneg %p1677_p2 }
  0x29   : > { %p1683_p9 = pnand %p1681_p8, %p1678_p3 }
  0x2b   : > { %1686 = shalt.err (!%p1683_p9)
}
  0x2c   : > { %s1687_s20 = scalar_lea.vmem %s1781_s25, 16384  ;;  %p1695_p13 = scmp.lt.s32.totalorder %s1781_s25, %s1781_s25 }
  0x2d   : > { %p1688_p10 = scmp.ne.s32.totalorder %s1781_s25, %s1687_s20  ;;  %p1696_p0 = scmp.lt.s32.totalorder %s1687_s20, %s1687_s20 }
  0x2f   : > { %p1690_p11 = pnand %p1688_p10, %p1648_p7  ;;  %p1697_p1 = por %p1696_p0, %p1695_p13 }
  0x31   : > { %p1691_p12 = pneg %p1690_p11 }
  0x33   : > { %p1698_p4 = pnand %p1697_p1, %p1691_p12 }
  0x35   : > { %1701 = shalt.err (!%p1698_p4)
}
  0x36   : > { %s1722_s28 = smov 128   ;;  %s1723_s29 = smov 8  }
  0x37   : > { %1594 = dma.hbm_to_vmem [thread:$0]  (!%p1777_p5), %s2000_s3, 16384, %s1781_s25, [#allocation5], %s1722_s28, %s1722_s28, %s1723_s29  }
  0x38   : > { %p2009_p6 = scmp.ne.s32.totalorder %s2006_s22, 0 }
  0x39   : > { %p2010_p7 = scmp.ne.s32.totalorder (!%p2009_p6), %s2007_s23, 0 }
  0x3a   : > { %214 = sbr.rel (%p2009_p6) target bundleno = 570 (0x23a), region = 40 }
  0x41   : > { %1707 = dma.done.wait (%p2010_p7), [#allocation3], 4096  }
  0x42   : > { %1709 = vsyncadd (%p2010_p7), [#allocation3], 4294963200 }
  0x43   : > { %1711 = dma.done.wait (%p2010_p7), [#allocation5], 16384  }
  0x44   : > { %1713 = vsyncadd (%p2010_p7), [#allocation5], 4294950912  ;;  %s1253_s26 = sshll.u32 %s1244_s21, 1  ;;  %v1724_v0 = vmov 0.0   ;;  %v261_v1 = vld [vmem:[#allocation2 + $0x8] sm:$0xff]  ;;  %v263_v3 = vld [vmem:[#allocation2 + $0x18] sm:$0xff] }
  0x45   : > { %405 = vmatprep.mubr.f32.mxu0 %v1724_v0  ;;  %482 = vmatprep.mubr.f32.mxu1 %v1724_v0  ;;  %p247_p5 = scmp.lt.s32.totalorder %s1253_s26, 3  ;;  %v269_v2 = vld [vmem:[#allocation2 + $0x48] sm:$0xff]  ;;  %v271_v5 = vld [vmem:[#allocation2 + $0x58] sm:$0xff]  ;;  %v260_v6 = vld [vmem:[#allocation2] sm:$0xff]  ;;  %vm334_vm0 = vcmask 261120  }
  0x46   : > { %v1420_v4 = vpack.c.bf16 %v269_v2, %v261_v1  ;;  %v268_v7 = vld [vmem:[#allocation2 + $0x40] sm:$0xff]  ;;  %v1428_v8 = vpack.c.bf16 %v271_v5, %v263_v3  ;;  %v262_v10 = vld [vmem:[#allocation2 + $0x10] sm:$0xff]  ;;  %v277_v12 = vld [vmem:[#allocation2 + $0x88] sm:$0xff] }
  0x47   : > { %s2012_s26 = smov (!%p247_p5, %s1253_s26), 3  ;;  %v1422_v9 = vpack.c.bf16 %v268_v7, %v260_v6  ;;  %v270_v11 = vld [vmem:[#allocation2 + $0x50] sm:$0xff]  ;;  %v285_v14 = vld [vmem:[#allocation2 + $0xc8] sm:$0xff]  ;;  %v279_v15 = vld [vmem:[#allocation2 + $0x98] sm:$0xff] }
  0x48   : > { %s1254_s22 = sshll.u32 %s2012_s26, 3  ;;  %1421 = vmatprep.subr.bf16.mxu0 %v1420_v4  ;;  %v1430_v13 = vpack.c.bf16 %v270_v11, %v262_v10  ;;  %v287_v16 = vld [vmem:[#allocation2 + $0xd8] sm:$0xff]  ;;  %1429 = vmatprep.subr.bf16.mxu1 %v1428_v8  ;;  %v1424_v17 = vpack.c.bf16 %v285_v14, %v277_v12  ;;  %v276_v19 = vld [vmem:[#allocation2 + $0x80] sm:$0xff]  ;;  %v278_v21 = vld [vmem:[#allocation2 + $0x90] sm:$0xff] }
  0x49   : > { %1423 = vmatpush1.bf16.msra.mxu0 %v1422_v9  ;;  %v1432_v18 = vpack.c.bf16 %v287_v16, %v279_v15  ;;  %v284_v20 = vld [vmem:[#allocation2 + $0xc0] sm:$0xff]  ;;  %s1852_s25 = scalar_lea.vmem %s1997_s0, %s1254_s22  ;;  %v286_v23 = vld [vmem:[#allocation2 + $0xd0] sm:$0xff]  ;;  %v265_v24 = vld [vmem:[#allocation2 + $0x28] sm:$0xff]  ;;  %s256_s13 = scalar_lea.vmem %s2002_s5, %s1254_s22 }
  0x4a   : > { %1431 = vmatpush1.bf16.msra.mxu1 %v1430_v13  ;;  %v1426_v22 = vpack.c.bf16 %v284_v20, %v276_v19  ;;  %1425 = vmatprep.subr.bf16.mxu0 %v1424_v17  ;;  %v1434_v25 = vpack.c.bf16 %v286_v23, %v278_v21  ;;  %v273_v26 = vld [vmem:[#allocation2 + $0x68] sm:$0xff]  ;;  %v264_v27 = vld [vmem:[#allocation2 + $0x20] sm:$0xff]  ;;  %v267_v31 = vld [vmem:[#allocation2 + $0x38] sm:$0xff] }
  0x4b   : > { %1433 = vmatprep.subr.bf16.mxu1 %v1432_v18  ;;  %v272_v28 = vld [vmem:[#allocation2 + $0x60] sm:$0xff]  ;;  %v1436_v30 = vpack.c.bf16 %v273_v26, %v265_v24  ;;  %v275_v32 = vld [vmem:[#allocation2 + $0x78] sm:$0xff]  ;;  %v266_v34 = vld [vmem:[#allocation2 + $0x30] sm:$0xff] }
  0x4c   : > { %v1855_v29 = vld [vmem:[%s1852_s25] sm:$0xff]  ;;  %v1444_v33 = vpack.c.bf16 %v275_v32, %v267_v31  ;;  %v274_v35 = vld [vmem:[#allocation2 + $0x70] sm:$0xff]  ;;  %v281_v36 = vld [vmem:[#allocation2 + $0xa8] sm:$0xff]  ;;  %v1438_v37 = vpack.c.bf16 %v272_v28, %v264_v27 }
  0x4d   : > { %1427 = vmatpush1.bf16.msra.mxu0 %v1426_v22  ;;  %v289_v38 = vld [vmem:[#allocation2 + $0xe8] sm:$0xff]  ;;  %v280_v39 = vld [vmem:[#allocation2 + $0xa0] sm:$0xff]  ;;  %v1446_v41 = vpack.c.bf16 %v274_v35, %v266_v34  ;;  %v283_v43 = vld [vmem:[#allocation2 + $0xb8] sm:$0xff] }
  0x4e   : > { %1435 = vmatpush1.bf16.msra.mxu1 %v1434_v25  ;;  %1437 = vmatprep.subr.bf16.mxu0 %v1436_v30  ;;  %v288_v40 = vld [vmem:[#allocation2 + $0xe0] sm:$0xff]  ;;  %v1440_v42 = vpack.c.bf16 %v289_v38, %v281_v36  ;;  %v291_v44 = vld [vmem:[#allocation2 + $0xf8] sm:$0xff]  ;;  %v282_v45 = vld [vmem:[#allocation2 + $0xb0] sm:$0xff] }
  0x4f   : > { %1445 = vmatprep.subr.bf16.mxu1 %v1444_v33  ;;  %v1448_v46 = vpack.c.bf16 %v291_v44, %v283_v43  ;;  %v290_v47 = vld [vmem:[#allocation2 + $0xf0] sm:$0xff]  ;;  %v745_v48 = vld [vmem:[#allocation4 + $0x80] sm:$0xff]  ;;  %v746_v49 = vld [vmem:[#allocation4 + $0x88] sm:$0xff]  ;;  %v1442_v53 = vpack.c.bf16 %v288_v40, %v280_v39 }
  0x50   : > { %1257 = vmatmul.mubr.msk.f32.vlgmr.msra.gmra.mrb[0].mxu0 %vm334_vm0, %v1855_v29  ;;  %v259_v50 = vld [vmem:[%s1852_s25 + $0x8] sm:$0xff]  ;;  %v777_v51 = vld [vmem:[#allocation4 + $0x180] sm:$0xff]  ;;  %v1450_v54 = vpack.c.bf16 %v290_v47, %v282_v45  ;;  %v1452_v55 = vpack.c.bf16 %v746_v49, %v745_v48  ;;  %v747_v61 = vld [vmem:[#allocation4 + $0x90] sm:$0xff] }
  0x51   : > { %1259 = vmatmul.mubr.msk.f32.vlgmr.msra.gmra.mrb[0].mxu1 %vm334_vm0, %v1855_v29  ;;  %411 = vmatprep.mubr.f32.mxu0 %v1724_v0  ;;  %v778_v52 = vld [vmem:[#allocation4 + $0x188] sm:$0xff]  ;;  %v729_v57 = vld [vmem:[#allocation4] sm:$0xff]  ;;  %v748_v62 = vld [vmem:[#allocation4 + $0x98] sm:$0xff] }
  0x52   : > { %1439 = vmatpush1.bf16.msra.mxu0 %v1438_v37  ;;  %488 = vmatprep.mubr.f32.mxu1 %v1724_v0  ;;  %v1484_v56 = vpack.c.bf16 %v778_v52, %v777_v51  ;;  %v730_v58 = vld [vmem:[#allocation4 + $0x8] sm:$0xff]  ;;  %v761_v59 = vld [vmem:[#allocation4 + $0x100] sm:$0xff]  ;;  %v779_v63 = vld [vmem:[#allocation4 + $0x190] sm:$0xff]  ;;  %v1456_v4 = vpack.c.bf16 %v748_v62, %v747_v61 }
  0x53   : > { %1447 = vmatpush1.bf16.msra.mxu1 %v1446_v41  ;;  %1441 = vmatprep.subr.bf16.mxu0 %v1440_v42  ;;  %v762_v60 = vld [vmem:[#allocation4 + $0x108] sm:$0xff]  ;;  %v780_v1 = vld [vmem:[#allocation4 + $0x198] sm:$0xff]  ;;  %v1454_v2 = vpack.c.bf16 %v730_v58, %v729_v57  ;;  %v731_v5 = vld [vmem:[#allocation4 + $0x10] sm:$0xff] }
  0x54   : > { %1258 = vmatmul.mubr.msk.f32.gmra.mrb[2].mxu0 %vm334_vm0, %v259_v50  ;;  %1449 = vmatprep.subr.bf16.mxu1 %v1448_v46  ;;  %v1486_v3 = vpack.c.bf16 %v762_v60, %v761_v59  ;;  %v732_v6 = vld [vmem:[#allocation4 + $0x18] sm:$0xff]  ;;  %v763_v7 = vld [vmem:[#allocation4 + $0x110] sm:$0xff]  ;;  %v1488_v8 = vpack.c.bf16 %v780_v1, %v779_v63  ;;  %v749_v10 = vld [vmem:[#allocation4 + $0xa0] sm:$0xff] }
  0x55   : > { %1260 = vmatmul.mubr.msk.f32.gmra.mrb[2].mxu1 %vm334_vm0, %v259_v50  ;;  %559 = vmatprep.mubr.f32.mxu0 %v1724_v0  ;;  %v764_v9 = vld [vmem:[#allocation4 + $0x118] sm:$0xff]  ;;  %v750_v11 = vld [vmem:[#allocation4 + $0xa8] sm:$0xff]  ;;  %v781_v12 = vld [vmem:[#allocation4 + $0x1a0] sm:$0xff]  ;;  %v1458_v14 = vpack.c.bf16 %v732_v6, %v731_v5 }
  0x56   : > { %1443 = vmatpush1.bf16.msra.mxu0 %v1442_v53  ;;  %636 = vmatprep.mubr.f32.mxu1 %v1724_v0  ;;  %v782_v13 = vld [vmem:[#allocation4 + $0x1a8] sm:$0xff]  ;;  %v1490_v15 = vpack.c.bf16 %v764_v9, %v763_v7  ;;  %v1460_v16 = vpack.c.bf16 %v750_v11, %v749_v10  ;;  %v733_v17 = vld [vmem:[#allocation4 + $0x20] sm:$0xff]  ;;  %v751_v23 = vld [vmem:[#allocation4 + $0xb0] sm:$0xff] }
  0x57   : > { %1451 = vmatpush1.bf16.msra.mxu1 %v1450_v54  ;;  %1453 = vmatprep.subr.bf16.mxu0 %v1452_v55  ;;  %v734_v18 = vld [vmem:[#allocation4 + $0x28] sm:$0xff]  ;;  %v1492_v19 = vpack.c.bf16 %v782_v13, %v781_v12  ;;  %v765_v20 = vld [vmem:[#allocation4 + $0x120] sm:$0xff]  ;;  %v752_v24 = vld [vmem:[#allocation4 + $0xb8] sm:$0xff] }
  0x58   : > { %1485 = vmatprep.subr.bf16.mxu1 %v1484_v56  ;;  %v766_v21 = vld [vmem:[#allocation4 + $0x128] sm:$0xff]  ;;  %v1462_v22 = vpack.c.bf16 %v734_v18, %v733_v17  ;;  %v783_v25 = vld [vmem:[#allocation4 + $0x1b0] sm:$0xff]  ;;  %v1464_v26 = vpack.c.bf16 %v752_v24, %v751_v23  ;;  %v784_v27 = vld [vmem:[#allocation4 + $0x1b8] sm:$0xff] }
  0x59   : > { %1261 = vmatmul.mubr.msk.f32.vlgmr.msra.gmra.mrb[4].mxu0 %vm334_vm0, %v1855_v29  ;;  %v735_v28 = vld [vmem:[#allocation4 + $0x30] sm:$0xff]  ;;  %v1496_v30 = vpack.c.bf16 %v784_v27, %v783_v25  ;;  %v768_v33 = vld [vmem:[#allocation4 + $0x138] sm:$0xff]  ;;  %v753_v35 = vld [vmem:[#allocation4 + $0xc0] sm:$0xff]  ;;  %v294_v25 = vlaneseq }
  0x5a   : > { %1263 = vmatmul.mubr.msk.f32.vlgmr.msra.gmra.mrb[4].mxu1 %vm334_vm0, %v1855_v29  ;;  %565 = vmatprep.mubr.f32.mxu0 %v1724_v0  ;;  %v736_v29 = vld [vmem:[#allocation4 + $0x38] sm:$0xff]  ;;  %v767_v32 = vld [vmem:[#allocation4 + $0x130] sm:$0xff]  ;;  %v754_v36 = vld [vmem:[#allocation4 + $0xc8] sm:$0xff] }
  0x5b   : > { %642 = vmatprep.mubr.f32.mxu1 %v1724_v0  ;;  %1455 = vmatpush3.bf16.msra.mxu0 %v1454_v2  ;;  %v1494_v0 = vpack.c.bf16 %v766_v21, %v765_v20  ;;  %v1466_v31 = vpack.c.bf16 %v736_v29, %v735_v28  ;;  %v1498_v34 = vpack.c.bf16 %v768_v33, %v767_v32  ;;  %v785_v37 = vld [vmem:[#allocation4 + $0x1c0] sm:$0xff]  ;;  %v786_v39 = vld [vmem:[#allocation4 + $0x1c8] sm:$0xff]  ;;  %v755_v47 = vld [vmem:[#allocation4 + $0xd0] sm:$0xff] }
  0x5c   : > { %1487 = vmatpush3.bf16.msra.mxu1 %v1486_v3  ;;  %1457 = vmatprep.subr.bf16.mxu0 %v1456_v4  ;;  %v1468_v38 = vpack.c.bf16 %v754_v36, %v753_v35  ;;  %v737_v40 = vld [vmem:[#allocation4 + $0x40] sm:$0xff]  ;;  %v738_v41 = vld [vmem:[#allocation4 + $0x48] sm:$0xff]  ;;  %v1500_v42 = vpack.c.bf16 %v786_v39, %v785_v37  ;;  %v756_v48 = vld [vmem:[#allocation4 + $0xd8] sm:$0xff] }
  0x5d   : > { %1262 = vmatmul.mubr.msk.f32.gmra.mrb[6].mxu0 %vm334_vm0, %v259_v50  ;;  %1489 = vmatprep.subr.bf16.mxu1 %v1488_v8  ;;  %v1470_v43 = vpack.c.bf16 %v738_v41, %v737_v40  ;;  %v769_v44 = vld [vmem:[#allocation4 + $0x140] sm:$0xff]  ;;  %v770_v45 = vld [vmem:[#allocation4 + $0x148] sm:$0xff]  ;;  %v787_v49 = vld [vmem:[#allocation4 + $0x1d0] sm:$0xff] }
  0x5e   : > { %1264 = vmatmul.mubr.msk.f32.gmra.mrb[6].mxu1 %vm334_vm0, %v259_v50  ;;  %v1502_v46 = vpack.c.bf16 %v770_v45, %v769_v44  ;;  %v1472_v50 = vpack.c.bf16 %v756_v48, %v755_v47  ;;  %v788_v51 = vld [vmem:[#allocation4 + $0x1d8] sm:$0xff]  ;;  %v739_v52 = vld [vmem:[#allocation4 + $0x50] sm:$0xff]  ;;  %v757_v59 = vld [vmem:[#allocation4 + $0xe0] sm:$0xff] }
  0x5f   : > { %1459 = vmatpush3.bf16.msra.mxu0 %v1458_v14  ;;  %v740_v53 = vld [vmem:[#allocation4 + $0x58] sm:$0xff]  ;;  %v1504_v54 = vpack.c.bf16 %v788_v51, %v787_v49  ;;  %v771_v56 = vld [vmem:[#allocation4 + $0x150] sm:$0xff]  ;;  %v758_v60 = vld [vmem:[#allocation4 + $0xe8] sm:$0xff] }
  0x60   : > { %1491 = vmatpush3.bf16.msra.mxu1 %v1490_v15  ;;  %1461 = vmatprep.subr.bf16.mxu0 %v1460_v16  ;;  %v1474_v55 = vpack.c.bf16 %v740_v53, %v739_v52  ;;  %v772_v57 = vld [vmem:[#allocation4 + $0x158] sm:$0xff]  ;;  %v789_v61 = vld [vmem:[#allocation4 + $0x1e0] sm:$0xff]  ;;  %v1476_v62 = vpack.c.bf16 %v758_v60, %v757_v59  ;;  %v790_v63 = vld [vmem:[#allocation4 + $0x1e8] sm:$0xff] }
  0x61   : > { %1493 = vmatprep.subr.bf16.mxu1 %v1492_v19  ;;  %v1506_v58 = vpack.c.bf16 %v772_v57, %v771_v56  ;;  %v741_v1 = vld [vmem:[#allocation4 + $0x60] sm:$0xff]  ;;  %v742_v2 = vld [vmem:[#allocation4 + $0x68] sm:$0xff]  ;;  %v1508_v3 = vpack.c.bf16 %v790_v63, %v789_v61  ;;  %v759_v8 = vld [vmem:[#allocation4 + $0xf0] sm:$0xff] }
  0x62   : > { %v1478_v4 = vpack.c.bf16 %v742_v2, %v741_v1  ;;  %v773_v5 = vld [vmem:[#allocation4 + $0x160] sm:$0xff]  ;;  %v774_v6 = vld [vmem:[#allocation4 + $0x168] sm:$0xff]  ;;  %v760_v9 = vld [vmem:[#allocation4 + $0xf8] sm:$0xff] }
  0x63   : > { %1463 = vmatpush3.bf16.msra.mxu0 %v1462_v22  ;;  %v1510_v7 = vpack.c.bf16 %v774_v6, %v773_v5  ;;  %v791_v10 = vld [vmem:[#allocation4 + $0x1f0] sm:$0xff]  ;;  %v1480_v11 = vpack.c.bf16 %v760_v9, %v759_v8  ;;  %v792_v12 = vld [vmem:[#allocation4 + $0x1f8] sm:$0xff]  ;;  %v809_v20 = vld [vmem:[#allocation4 + $0x280] sm:$0xff] }
  0x64   : > { %1495 = vmatpush3.bf16.msra.mxu1 %v1494_v0  ;;  %1465 = vmatprep.subr.bf16.mxu0 %v1464_v26  ;;  %v743_v13 = vld [vmem:[#allocation4 + $0x70] sm:$0xff]  ;;  %v744_v14 = vld [vmem:[#allocation4 + $0x78] sm:$0xff]  ;;  %v1512_v15 = vpack.c.bf16 %v792_v12, %v791_v10  ;;  %v810_v21 = vld [vmem:[#allocation4 + $0x288] sm:$0xff]  ;;  %v1876_v26 = vshrl.u32 %v294_v25, 7 }
  0x65   : > { %1497 = vmatprep.subr.bf16.mxu1 %v1496_v30  ;;  %v1482_v16 = vpack.c.bf16 %v744_v14, %v743_v13  ;;  %v775_v17 = vld [vmem:[#allocation4 + $0x170] sm:$0xff]  ;;  %v776_v18 = vld [vmem:[#allocation4 + $0x178] sm:$0xff]  ;;  %v841_v22 = vld [vmem:[#allocation4 + $0x380] sm:$0xff]  ;;  %v1516_v0 = vpack.c.bf16 %v810_v21, %v809_v20 }
  0x66   : > { %v1514_v19 = vpack.c.bf16 %v776_v18, %v775_v17  ;;  %v842_v23 = vld [vmem:[#allocation4 + $0x388] sm:$0xff]  ;;  %v296_v27 = vsub.s32 0, %v1876_v26  ;;  %v1882_v28 = vld [vmem:[%s1999_s2] sm:$0xff]  ;;  %v304_v29 = vsub.s32 2, %v1876_v26  ;;  %v300_v30 = vsub.s32 1, %v1876_v26  ;;  %v812_v25 = vld [vmem:[#allocation4 + $0x298] sm:$0xff] }
  0x67   : > { %1467 = vmatpush3.bf16.msra.mxu0 %v1466_v31  ;;  %v1548_v24 = vpack.c.bf16 %v842_v23, %v841_v22  ;;  %v308_v31 = vsub.s32 3, %v1876_v26  ;;  %v316_v47 = vsub.s32 5, %v1876_v26  ;;  %v324_v48 = vsub.s32 7, %v1876_v26  ;;  %v1923_v8 = vld [vmem:[#allocation4 + $0x200] sm:$0xff]  ;;  %v794_v10 = vld [vmem:[#allocation4 + $0x208] sm:$0xff] }
  0x68   : > { %1499 = vmatpush3.bf16.msra.mxu1 %v1498_v34  ;;  %1469 = vmatprep.subr.bf16.mxu0 %v1468_v38  ;;  %v297_v32 = vrot.slane %v1882_v28, %v296_v27  ;;  %v305_v33 = vrot.slane %v1882_v28, %v304_v29  ;;  %v301_v34 = vrot.slane %v1882_v28, %v300_v30  ;;  %v1928_v12 = vld [vmem:[#allocation4 + $0x308] sm:$0xff]  ;;  %v312_v18 = vsub.s32 4, %v1876_v26 }
  0x69   : > { %1501 = vmatprep.subr.bf16.mxu1 %v1500_v42  ;;  %v309_v35 = vrot.slane %v1882_v28, %v308_v31  ;;  %v1904_v59 = vrot.slane %v1882_v28, %v316_v47  ;;  %v1907_v60 = vrot.slane %v1882_v28, %v324_v48  ;;  %v320_v22 = vsub.s32 6, %v1876_v26 }
  0x6b   : > { %1471 = vmatpush3.bf16.msra.mxu0 %v1470_v43 }
  0x6c   : > { %1503 = vmatpush3.bf16.msra.mxu1 %v1502_v46  ;;  %1473 = vmatprep.subr.bf16.mxu0 %v1472_v50 }
  0x6d   : > { %1505 = vmatprep.subr.bf16.mxu1 %v1504_v54 }
  0x6f   : > { %1475 = vmatpush3.bf16.msra.mxu0 %v1474_v55 }
  0x70   : > { %1507 = vmatpush3.bf16.msra.mxu1 %v1506_v58  ;;  %1477 = vmatprep.subr.bf16.mxu0 %v1476_v62 }
  0x71   : > { %1509 = vmatprep.subr.bf16.mxu1 %v1508_v3 }
  0x73   : > { %1479 = vmatpush3.bf16.msra.mxu0 %v1478_v4 }
  0x74   : > { %1511 = vmatpush3.bf16.msra.mxu1 %v1510_v7  ;;  %1481 = vmatprep.subr.bf16.mxu0 %v1480_v11  ;;  %v1926_v11 = vld [vmem:[#allocation4 + $0x300] sm:$0xff] }
  0x75   : > { %1513 = vmatprep.subr.bf16.mxu1 %v1512_v15  ;;  %v1550_v23 = vpack.c.bf16 %v1928_v12, %v1926_v11  ;;  %v321_v11 = vrot.slane %v1882_v28, %v320_v22 }
  0x77   : > { %1483 = vmatpush3.bf16.msra.mxu0 %v1482_v16 }
  0x78   : > { %1515 = vmatpush3.bf16.msra.mxu1 %v1514_v19  ;;  %1517 = vmatprep.subr.bf16.mxu0 %v1516_v0  ;;  %v1518_v0 = vpack.c.bf16 %v794_v10, %v1923_v8  ;;  %v846_v8 = vld [vmem:[#allocation4 + $0x3a8] sm:$0xff] }
  0x79   : > { %1549 = vmatprep.subr.bf16.mxu1 %v1548_v24  ;;  %v811_v24 = vld [vmem:[#allocation4 + $0x290] sm:$0xff] }
 0x123   : > { %v407_v36 = vpop.f32.mrb[0].mxu0 }
 0x124   : > { %v1891_v37 = vadd.f32 %v407_v36, %v297_v32  ;;  %v484_v38 = vpop.f32.mrb[0].mxu1  ;;  %v409_v39 = vpop.f32.mrb[1].mxu0 }
 0x125   : > { %v1893_v40 = vadd.f32 %v484_v38, %v305_v33  ;;  %v410_v41 = vadd.f32 %v409_v39, %v301_v34  ;;  %v486_v42 = vpop.f32.mrb[1].mxu1 }
 0x126   : > { %v665_v43 = vmul.f32 0.70710677, %v1891_v37  ;;  %v487_v44 = vadd.f32 %v486_v42, %v309_v35 }
 0x127   : > { %v667_v45 = vmul.f32 0.70710677, %v1893_v40  ;;  %v666_v46 = vmul.f32 0.70710677, %v410_v41  ;;  %v413_v50 = vpop.f32.mrb[2].mxu0  ;;  %v650_v30 = vmul.f32 0.5, %v410_v41 }
 0x128   : > { %1614 = verf.f32 %v665_v43  ;;  %v668_v49 = vmul.f32 0.70710677, %v487_v44  ;;  %v490_v51 = vpop.f32.mrb[2].mxu1  ;;  %v414_v52 = vadd.f32 %v413_v50, %v297_v32  ;;  %v415_v53 = vpop.f32.mrb[3].mxu0  ;;  %v843_v32 = vld [vmem:[#allocation4 + $0x390] sm:$0xff]  ;;  %v651_v39 = vmul.f32 0.5, %v1893_v40 }
 0x129   : > { %1616 = verf.f32 %v667_v45  ;;  %v1899_v54 = vadd.f32 %v490_v51, %v305_v33  ;;  %v492_v55 = vpop.f32.mrb[3].mxu1  ;;  %v416_v56 = vadd.f32 %v415_v53, %v301_v34  ;;  %v844_v33 = vld [vmem:[#allocation4 + $0x398] sm:$0xff]  ;;  %v649_v34 = vmul.f32 0.5, %v1891_v37  ;;  %v795_v50 = vld [vmem:[#allocation4 + $0x210] sm:$0xff] }
 0x12a   : > { %1618 = verf.f32 %v666_v46  ;;  %v1901_v57 = vadd.f32 %v492_v55, %v309_v35  ;;  %v673_v58 = vmul.f32 0.70710677, %v414_v52  ;;  %v652_v35 = vmul.f32 0.5, %v487_v44  ;;  %v796_v51 = vld [vmem:[#allocation4 + $0x218] sm:$0xff]  ;;  %v827_v53 = vld [vmem:[#allocation4 + $0x310] sm:$0xff] }
 0x12b   : > { %1620 = verf.f32 %v668_v49  ;;  %v674_v61 = vmul.f32 0.70710677, %v416_v56  ;;  %v675_v62 = vmul.f32 0.70710677, %v1899_v54  ;;  %v657_v38 = vmul.f32 0.5, %v414_v52  ;;  %v828_v40 = vld [vmem:[#allocation4 + $0x318] sm:$0xff] }
 0x12c   : > { %1622 = verf.f32 %v673_v58  ;;  %v676_v63 = vmul.f32 0.70710677, %v1901_v57  ;;  %v1911_v1 = vpop.f32.mrb[4].mxu0  ;;  %v658_v42 = vmul.f32 0.5, %v416_v56  ;;  %v1520_v45 = vpack.c.bf16 %v812_v25, %v811_v24  ;;  %v813_v56 = vld [vmem:[#allocation4 + $0x2a0] sm:$0xff] }
 0x12d   : > { %v1913_v2 = vpop.f32.mrb[4].mxu1  ;;  %1624 = verf.f32 %v674_v61  ;;  %v563_v3 = vpop.f32.mrb[5].mxu0  ;;  %v1552_v41 = vpack.c.bf16 %v844_v33, %v843_v32  ;;  %v659_v44 = vmul.f32 0.5, %v1899_v54  ;;  %v660_v52 = vmul.f32 0.5, %v1901_v57  ;;  %v814_v61 = vld [vmem:[#allocation4 + $0x2a8] sm:$0xff]  ;;  %v797_v57 = vld [vmem:[#allocation4 + $0x220] sm:$0xff] }
 0x12e   : > { %v640_v4 = vpop.f32.mrb[5].mxu1  ;;  %1626 = verf.f32 %v675_v62  ;;  %v1916_v5 = vadd.f32 %v563_v3, %v1904_v59  ;;  %v1947_v3 = vrot.slane %v1882_v28, %v312_v18  ;;  %v1522_v54 = vpack.c.bf16 %v796_v51, %v795_v50  ;;  %v798_v18 = vld [vmem:[#allocation4 + $0x228] sm:$0xff]  ;;  %v816_v28 = vld [vmem:[#allocation4 + $0x2b8] sm:$0xff] }
 0x12f   : > { %v1919_v6 = vadd.f32 %v640_v4, %v1907_v60  ;;  %1628 = verf.f32 %v676_v63  ;;  %v845_v4 = vld [vmem:[#allocation4 + $0x3a0] sm:$0xff]  ;;  %v1957_v33 = vadd.f32 %v1913_v2, %v321_v11 }
 0x130   : > { %v1921_v7 = vpop.f32.mrb[6].mxu0  ;;  %v670_v9 = vmul.f32 0.70710677, %v1916_v5  ;;  %v1556_v25 = vpack.c.bf16 %v846_v8, %v845_v4 }
 0x131   : > { %v672_v14 = vmul.f32 0.70710677, %v1919_v6  ;;  %v1931_v15 = vpop.f32.mrb[7].mxu0  ;;  %v1933_v16 = vpop.f32.mrb[6].mxu1  ;;  %v1971_v50 = vadd.f32 %v1921_v7, %v1947_v3  ;;  %v834_v7 = vld [vmem:[#allocation4 + $0x348] sm:$0xff] }
 0x132   : > { %v1615_v13 = vpop.eup %1614  ;;  %1630 = verf.f32 %v670_v9  ;;  %v1936_v19 = vpop.f32.mrb[7].mxu1  ;;  %v1975_v51 = vadd.f32 %v1933_v16, %v321_v11  ;;  %v804_v11 = vld [vmem:[#allocation4 + $0x258] sm:$0xff] }
 0x133   : > { %v1617_v17 = vpop.eup %1616  ;;  %v697_v21 = vadd.f32 1.0, %v1615_v13  ;;  %1632 = verf.f32 %v672_v14  ;;  %v654_v13 = vmul.f32 0.5, %v1916_v5  ;;  %v1554_v14 = vpack.c.bf16 %v828_v40, %v827_v53 }
 0x134   : > { %v1619_v20 = vpop.eup %1618  ;;  %v699_v29 = vadd.f32 1.0, %v1617_v17  ;;  %v1524_v17 = vpack.c.bf16 %v814_v61, %v813_v56  ;;  %v1965_v2 = vadd.f32 %v1936_v19, %v1907_v60  ;;  %v819_v56 = vld [vmem:[#allocation4 + $0x2d0] sm:$0xff]  ;;  %v820_v61 = vld [vmem:[#allocation4 + $0x2d8] sm:$0xff]  ;;  %v677_v16 = vmul.f32 0.70710677, %v1971_v50 }
 0x135   : > { %v1621_v27 = vpop.eup %1620  ;;  %v698_v31 = vadd.f32 1.0, %v1619_v20  ;;  %v713_v47 = vmul.f32 %v697_v21, %v649_v34  ;;  %v829_v20 = vld [vmem:[#allocation4 + $0x320] sm:$0xff]  ;;  %v830_v21 = vld [vmem:[#allocation4 + $0x328] sm:$0xff]  ;;  %v1526_v34 = vpack.c.bf16 %v798_v18, %v797_v57  ;;  %v679_v4 = vmul.f32 0.70710677, %v1975_v51 }
 0x136   : > { %v700_v36 = vadd.f32 1.0, %v1621_v27  ;;  %v1623_v26 = vpop.eup %1622  ;;  %v715_v58 = vmul.f32 %v699_v29, %v651_v39  ;;  %v815_v27 = vld [vmem:[#allocation4 + $0x2b0] sm:$0xff]  ;;  %v1953_v29 = vadd.f32 %v1911_v1, %v1947_v3  ;;  %v854_v18 = vld [vmem:[#allocation4 + $0x3e8] sm:$0xff] }
 0x137   : > { %v714_v43 = vmul.f32 %v698_v31, %v650_v30  ;;  %v1625_v46 = vpop.eup %1624  ;;  %v705_v48 = vadd.f32 1.0, %v1623_v26  ;;  %v847_v30 = vld [vmem:[#allocation4 + $0x3b0] sm:$0xff]  ;;  %v848_v31 = vld [vmem:[#allocation4 + $0x3b8] sm:$0xff]  ;;  %v1528_v1 = vpack.c.bf16 %v816_v28, %v815_v27  ;;  %v806_v27 = vld [vmem:[#allocation4 + $0x268] sm:$0xff] }
 0x138   : > { %v716_v49 = vmul.f32 %v700_v36, %v652_v35  ;;  %v1627_v55 = vpop.eup %1626  ;;  %v706_v37 = vadd.f32 1.0, %v1625_v46  ;;  %v1558_v35 = vpack.c.bf16 %v830_v21, %v829_v20  ;;  %v800_v26 = vld [vmem:[#allocation4 + $0x238] sm:$0xff]  ;;  %v831_v39 = vld [vmem:[#allocation4 + $0x330] sm:$0xff]  ;;  %v817_v46 = vld [vmem:[#allocation4 + $0x2c0] sm:$0xff] }
 0x139   : > { %928 = vmatprep.mubr.f32.mxu0 %v714_v43  ;;  %v1629_v62 = vpop.eup %1628  ;;  %v707_v63 = vadd.f32 1.0, %v1627_v55  ;;  %v721_v9 = vmul.f32 %v705_v48, %v657_v38  ;;  %v1961_v38 = vadd.f32 %v1931_v15, %v1904_v59  ;;  %v1560_v43 = vpack.c.bf16 %v848_v31, %v847_v30  ;;  %v849_v15 = vld [vmem:[#allocation4 + $0x3c0] sm:$0xff]  ;;  %v850_v48 = vld [vmem:[#allocation4 + $0x3c8] sm:$0xff]  ;;  %v855_v30 = vld [vmem:[#allocation4 + $0x3f0] sm:$0xff] }
 0x13a   : > { %1003 = vmatprep.mubr.f32.mxu1 %v716_v49  ;;  %929 = vmatmul.mubr.f32.vlgmr.msra.gmra.mrb[8].mxu0 %v713_v47  ;;  %v708_v10 = vadd.f32 1.0, %v1629_v62  ;;  %v722_v12 = vmul.f32 %v706_v37, %v658_v42  ;;  %v818_v47 = vld [vmem:[#allocation4 + $0x2c8] sm:$0xff]  ;;  %v669_v59 = vmul.f32 0.70710677, %v1953_v29  ;;  %v1564_v40 = vpack.c.bf16 %v850_v48, %v849_v15  ;;  %v851_v62 = vld [vmem:[#allocation4 + $0x3d0] sm:$0xff]  ;;  %v837_v28 = vld [vmem:[#allocation4 + $0x360] sm:$0xff] }
 0x13b   : > { %1004 = vmatmul.mubr.f32.vlgmr.msra.gmra.mrb[8].mxu1 %v715_v58  ;;  %1519 = vmatpush3.bf16.msra.mxu0 %v1518_v0  ;;  %v723_v0 = vmul.f32 %v707_v63, %v659_v44  ;;  %v678_v19 = vmul.f32 0.70710677, %v1961_v38  ;;  %v1532_v55 = vpack.c.bf16 %v818_v47, %v817_v46  ;;  %v801_v58 = vld [vmem:[#allocation4 + $0x240] sm:$0xff]  ;;  %v802_v37 = vld [vmem:[#allocation4 + $0x248] sm:$0xff]  ;;  %v852_v63 = vld [vmem:[#allocation4 + $0x3d8] sm:$0xff] }
 0x13c   : > { %1551 = vmatpush3.bf16.msra.mxu1 %v1550_v23  ;;  %1521 = vmatprep.subr.bf16.mxu0 %v1520_v45  ;;  %v1631_v24 = vpop.eup %1630  ;;  %v724_v22 = vmul.f32 %v708_v10, %v660_v52  ;;  %v656_v23 = vmul.f32 0.5, %v1919_v6  ;;  %v799_v6 = vld [vmem:[#allocation4 + $0x230] sm:$0xff]  ;;  %v832_v45 = vld [vmem:[#allocation4 + $0x338] sm:$0xff]  ;;  %v833_v44 = vld [vmem:[#allocation4 + $0x340] sm:$0xff]  ;;  %v680_v52 = vmul.f32 0.70710677, %v1965_v2  ;;  %1634 = verf.f32 %v669_v59 }
 0x13d   : > { %1553 = vmatprep.subr.bf16.mxu1 %v1552_v41  ;;  %933 = vmatprep.mubr.f32.mxu0 %v722_v12  ;;  %v702_v5 = vadd.f32 1.0, %v1631_v24  ;;  %v1633_v32 = vpop.eup %1632  ;;  %v671_v41 = vmul.f32 0.70710677, %v1957_v33  ;;  %v1530_v60 = vpack.c.bf16 %v800_v26, %v799_v6  ;;  %v1562_v53 = vpack.c.bf16 %v832_v45, %v831_v39  ;;  %v803_v10 = vld [vmem:[#allocation4 + $0x250] sm:$0xff]  ;;  %v836_v12 = vld [vmem:[#allocation4 + $0x358] sm:$0xff] }
 0x13e   : > { %934 = vmatmul.mubr.f32.gmra.mrb[10].mxu0 %v721_v9  ;;  %1008 = vmatprep.mubr.f32.mxu1 %v724_v22  ;;  %v704_v36 = vadd.f32 1.0, %v1633_v32  ;;  %v1534_v3 = vpack.c.bf16 %v802_v37, %v801_v58  ;;  %v1566_v8 = vpack.c.bf16 %v834_v7, %v833_v44  ;;  %v1536_v9 = vpack.c.bf16 %v820_v61, %v819_v56  ;;  %v856_v31 = vld [vmem:[#allocation4 + $0x3f8] sm:$0xff] }
 0x13f   : > { %1523 = vmatpush3.bf16.msra.mxu0 %v1522_v54  ;;  %v718_v42 = vmul.f32 %v702_v5, %v654_v13  ;;  %1009 = vmatmul.mubr.f32.gmra.mrb[10].mxu1 %v723_v0  ;;  %1636 = verf.f32 %v671_v41  ;;  %v835_v54 = vld [vmem:[#allocation4 + $0x350] sm:$0xff]  ;;  %v1568_v57 = vpack.c.bf16 %v852_v63, %v851_v62  ;;  %v821_v13 = vld [vmem:[#allocation4 + $0x2e0] sm:$0xff]  ;;  %v1538_v20 = vpack.c.bf16 %v804_v11, %v803_v10  ;;  %v838_v0 = vld [vmem:[#allocation4 + $0x368] sm:$0xff] }
 0x140   : > { %1555 = vmatpush3.bf16.msra.mxu1 %v1554_v14  ;;  %1525 = vmatprep.subr.bf16.mxu0 %v1524_v17  ;;  %v720_v49 = vmul.f32 %v704_v36, %v656_v23  ;;  %1638 = verf.f32 %v678_v19  ;;  %v822_v14 = vld [vmem:[#allocation4 + $0x2e8] sm:$0xff]  ;;  %v853_v17 = vld [vmem:[#allocation4 + $0x3e0] sm:$0xff]  ;;  %v1570_v21 = vpack.c.bf16 %v836_v12, %v835_v54  ;;  %v823_v5 = vld [vmem:[#allocation4 + $0x2f0] sm:$0xff]  ;;  %v1576_v39 = vpack.c.bf16 %v856_v31, %v855_v30 }
 0x141   : > { %1557 = vmatprep.subr.bf16.mxu1 %v1556_v25  ;;  %1078 = vmatprep.mubr.f32.mxu0 %v718_v42  ;;  %1640 = verf.f32 %v680_v52  ;;  %v1540_v24 = vpack.c.bf16 %v822_v14, %v821_v13  ;;  %v805_v25 = vld [vmem:[#allocation4 + $0x260] sm:$0xff]  ;;  %v1572_v22 = vpack.c.bf16 %v854_v18, %v853_v17  ;;  %v824_v23 = vld [vmem:[#allocation4 + $0x2f8] sm:$0xff]  ;;  %v839_v42 = vld [vmem:[#allocation4 + $0x370] sm:$0xff]  ;;  %v653_v59 = vmul.f32 0.5, %v1953_v29 }
 0x142   : > { %1153 = vmatprep.mubr.f32.mxu1 %v720_v49  ;;  %1642 = verf.f32 %v677_v16  ;;  %v1542_v32 = vpack.c.bf16 %v806_v27, %v805_v25  ;;  %v1544_v36 = vpack.c.bf16 %v824_v23, %v823_v5  ;;  %v808_v6 = vld [vmem:[#allocation4 + $0x278] sm:$0xff]  ;;  %v655_v41 = vmul.f32 0.5, %v1957_v33 }
 0x143   : > { %1527 = vmatpush3.bf16.msra.mxu0 %v1526_v34  ;;  %1644 = verf.f32 %v679_v4  ;;  %v662_v19 = vmul.f32 0.5, %v1961_v38  ;;  %v664_v58 = vmul.f32 0.5, %v1965_v2  ;;  %v661_v29 = vmul.f32 0.5, %v1971_v50  ;;  %v1265_v50 = vld [vmem:[%s2001_s4] ss:$0 sm:$0xff] }
 0x144   : > { %1559 = vmatpush3.bf16.msra.mxu1 %v1558_v35  ;;  %1529 = vmatprep.subr.bf16.mxu0 %v1528_v1  ;;  %v1574_v35 = vpack.c.bf16 %v838_v0, %v837_v28  ;;  %v807_v1 = vld [vmem:[#allocation4 + $0x270] sm:$0xff]  ;;  %v663_v7 = vmul.f32 0.5, %v1975_v51 }
 0x145   : > { %1561 = vmatprep.subr.bf16.mxu1 %v1560_v43  ;;  %v840_v43 = vld [vmem:[#allocation4 + $0x378] sm:$0xff]  ;;  %v1546_v47 = vpack.c.bf16 %v808_v6, %v807_v1 }
 0x146   : > { %v1635_v34 = vpop.eup %1634  ;;  %v1578_v48 = vpack.c.bf16 %v840_v43, %v839_v42 }
 0x147   : > { %1531 = vmatpush3.bf16.msra.mxu0 %v1530_v60  ;;  %v701_v15 = vadd.f32 1.0, %v1635_v34 }
 0x148   : > { %1563 = vmatpush3.bf16.msra.mxu1 %v1562_v53  ;;  %1533 = vmatprep.subr.bf16.mxu0 %v1532_v55 }
 0x149   : > { %1565 = vmatprep.subr.bf16.mxu1 %v1564_v40  ;;  %v1637_v26 = vpop.eup %1636  ;;  %v717_v44 = vmul.f32 %v701_v15, %v653_v59 }
 0x14a   : > { %v1639_v45 = vpop.eup %1638  ;;  %v703_v60 = vadd.f32 1.0, %v1637_v26 }
 0x14b   : > { %1535 = vmatpush3.bf16.msra.mxu0 %v1534_v3  ;;  %v1641_v46 = vpop.eup %1640  ;;  %v710_v53 = vadd.f32 1.0, %v1639_v45 }
 0x14c   : > { %1567 = vmatpush3.bf16.msra.mxu1 %v1566_v8  ;;  %1537 = vmatprep.subr.bf16.mxu0 %v1536_v9  ;;  %v1643_v49 = vpop.eup %1642  ;;  %v712_v37 = vadd.f32 1.0, %v1641_v46  ;;  %v719_v40 = vmul.f32 %v703_v60, %v655_v41 }
 0x14d   : > { %1569 = vmatprep.subr.bf16.mxu1 %v1568_v57  ;;  %v1645_v55 = vpop.eup %1644  ;;  %v709_v52 = vadd.f32 1.0, %v1643_v49  ;;  %v726_v33 = vmul.f32 %v710_v53, %v662_v19 }
 0x14e   : > { %v711_v56 = vadd.f32 1.0, %v1645_v55  ;;  %v728_v61 = vmul.f32 %v712_v37, %v664_v58 }
 0x14f   : > { %1539 = vmatpush3.bf16.msra.mxu0 %v1538_v20  ;;  %v725_v38 = vmul.f32 %v709_v52, %v661_v29 }
 0x150   : > { %1571 = vmatpush3.bf16.msra.mxu1 %v1570_v21  ;;  %1541 = vmatprep.subr.bf16.mxu0 %v1540_v24  ;;  %v727_v62 = vmul.f32 %v711_v56, %v663_v7 }
 0x151   : > { %1573 = vmatprep.subr.bf16.mxu1 %v1572_v22 }
 0x153   : > { %1543 = vmatpush3.bf16.msra.mxu0 %v1542_v32 }
 0x154   : > { %1575 = vmatpush3.bf16.msra.mxu1 %v1574_v35  ;;  %1545 = vmatprep.subr.bf16.mxu0 %v1544_v36 }
 0x155   : > { %1577 = vmatprep.subr.bf16.mxu1 %v1576_v39 }
 0x157   : > { %1547 = vmatpush3.bf16.msra.mxu0 %v1546_v47 }
 0x158   : > { %1579 = vmatpush3.bf16.msra.mxu1 %v1578_v48 }
 0x15a   : > { %1079 = vmatmul.mubr.f32.vlgmr.msra.gmra.mrb[12].mxu0 %v717_v44 }
 0x15b   : > { %1154 = vmatmul.mubr.f32.vlgmr.msra.gmra.mrb[12].mxu1 %v719_v40  ;;  %1083 = vmatprep.mubr.f32.mxu0 %v726_v33 }
 0x15c   : > { %1158 = vmatprep.mubr.f32.mxu1 %v728_v61 }
 0x15e   : > { %1084 = vmatmul.mubr.f32.gmra.mrb[14].mxu0 %v725_v38 }
 0x15f   : > { %1159 = vmatmul.mubr.f32.gmra.mrb[14].mxu1 %v727_v62 }
 0x20d   : > { %v1300_v2 = vpop.f32.mrb[8].mxu0 }
 0x20e   : > { %v1338_v63 = vpop.f32.mrb[8].mxu1  ;;  %v1301_v16 = vpop.f32.mrb[9].mxu0 }
 0x20f   : > { %v1302_v3 = vadd.f32 %v1301_v16, %v1300_v2  ;;  %v1339_v51 = vpop.f32.mrb[9].mxu1 }
 0x210   : > { %v1340_v4 = vadd.f32 %v1339_v51, %v1338_v63 }
 0x211   : > { %v931_v8 = vadd.f32 %v1302_v3, %v1265_v50  ;;  %v1303_v9 = vpop.f32.mrb[10].mxu0 }
 0x212   : > { %v1304_v10 = vpop.f32.mrb[11].mxu0  ;;  %v1341_v57 = vpop.f32.mrb[10].mxu1 }
 0x213   : > { %v1006_v11 = vadd.f32 %v1340_v4, %v931_v8  ;;  %v1305_v54 = vadd.f32 %v1304_v10, %v1303_v9  ;;  %v1342_v13 = vpop.f32.mrb[11].mxu1 }
 0x214   : > { %v1343_v14 = vadd.f32 %v1342_v13, %v1341_v57 }
 0x215   : > { %v936_v12 = vadd.f32 %v1305_v54, %v1265_v50 }
 0x217   : > { %v1011_v17 = vadd.f32 %v1343_v14, %v936_v12 }
 0x22d   : > { %v1376_v18 = vpop.f32.mrb[12].mxu0 }
 0x22e   : > { %v1414_v20 = vpop.f32.mrb[12].mxu1  ;;  %v1377_v21 = vpop.f32.mrb[13].mxu0 }
 0x22f   : > { %v1378_v24 = vadd.f32 %v1377_v21, %v1376_v18  ;;  %v1415_v25 = vpop.f32.mrb[13].mxu1 }
 0x230   : > { %v1416_v27 = vadd.f32 %v1415_v25, %v1414_v20 }
 0x231   : > { %v1081_v28 = vadd.f32 %v1378_v24, %v1006_v11  ;;  %v1379_v22 = vpop.f32.mrb[14].mxu0 }
 0x232   : > { %v1417_v0 = vpop.f32.mrb[14].mxu1  ;;  %v1380_v5 = vpop.f32.mrb[15].mxu0 }
 0x233   : > { %v1156_v23 = vadd.f32 %v1416_v27, %v1081_v28  ;;  %v1381_v30 = vadd.f32 %v1380_v5, %v1379_v22  ;;  %v1418_v31 = vpop.f32.mrb[15].mxu1 }
 0x234   : > { %v1419_v32 = vadd.f32 %v1418_v31, %v1417_v0 }
 0x235   : > { %1164 = vst [vmem:[%s256_s13] sm:$0xff] %v1156_v23  ;;  %v1086_v34 = vadd.f32 %v1381_v30, %v1011_v17 }
 0x237   : > { %v1161_v35 = vadd.f32 %v1419_v32, %v1086_v34 }
 0x239   : > { %1165 = vst [vmem:[%s256_s13 + $0x8] sm:$0xff] %v1161_v35 }
 0x23a PF: > { %s17_s18 = sadd.s32 1, %s1716_s18  }
 0x23b   : > { %p14_p2 = scmp.ge.s32.totalorder %s17_s18, 4  }
 0x23d   :  { %16 = sbr.rel (!%p14_p2) target bundleno = 2 (0x2), region = 79 }
 0x244   :  { %1188 = vsyncpa [#allocation3], 1 }
 0x245   :  { %1190 = vsyncpa [#allocation3 + $0x1], 1 }
 0x246   :  { %1191 = vsyncpa [#allocation5], 1 }

</bundles_post_ra>
